<compile_context>
chip_gen: v7x
topology: tpu7x:2x2x1
jax: 0.10.0
libtpu: 0.0.40
codegen_flags: <defaults>
</compile_context>

<pallas_src>
import jax
import jax.numpy as jnp
from jax.experimental import pallas as pl
from jax.experimental.pallas import tpu as pltpu


def _round_up(n, m):
    return ((n + m - 1) // m) * m


def mlp_kernel(x_ref,
               w1_ref, b1_ref,
               w2_ref, b2_ref,
               w3_ref, b3_ref,
               w4_ref, b4_ref,
               o_ref):
    # x_ref: (1, L) — batch along lanes (lane-dense).
    x = x_ref[...]

    # fc1 (1 -> 64): K=1 matmul is just a broadcast outer product — pure VPU,
    # skip the MXU push/drain entirely.
    h = jnp.maximum(w1_ref[...] * x + b1_ref[...], 0.0)               # (64, L)

    # fc2 (64 -> 32) / fc3 (32 -> 16): feature-major matmuls on the MXU,
    # batch stays on the lane axis so results are lane-dense.
    h = jnp.maximum(
        jnp.dot(w2_ref[...], h, preferred_element_type=jnp.float32)
        + b2_ref[...], 0.0)                                            # (32, L)
    h = jnp.maximum(
        jnp.dot(w3_ref[...], h, preferred_element_type=jnp.float32)
        + b3_ref[...], 0.0)                                            # (16, L)

    # fc4 (16 -> 1): N=1 matmul replaced by a 16-row multiply + sublane
    # reduction (VPU/XLU slots), keeping the MXU free.
    y = jnp.sum(w4_ref[...] * h, axis=0, keepdims=True) + b4_ref[...]  # (1, L)

    # torch.clamp(x, min=0, max=180)
    o_ref[...] = jnp.clip(y, 0.0, 180.0).astype(o_ref.dtype)


def net_forward(x, params, *, tile_lanes=8192):
    """x: [B, 1] float32.  params: torch-layout weights/biases (see init_params)."""
    B = x.shape[0]
    assert x.shape == (B, 1)
    assert tile_lanes % 128 == 0

    # Lane-dense batch layout: [B, 1] -> [1, padded_B], batch mapped to lanes.
    lanes = min(tile_lanes, _round_up(B, 128))
    padded = _round_up(B, lanes)
    x_flat = jnp.pad(x[:, 0], (0, padded - B)).reshape(1, padded)

    w1, b1 = params["w1"], params["b1"]        # (64, 1), (64, 1)
    w2, b2 = params["w2"], params["b2"]        # (32, 64), (32, 1)
    w3, b3 = params["w3"], params["b3"]        # (16, 32), (16, 1)
    w4c = params["w4"].reshape(-1, 1)          # (1, 16) -> (16, 1) column
    b4 = params["b4"]                          # (1, 1)

    # Tiny constant weights/biases: whole-array, VMEM-resident once
    # (no per-grid-step pipeline double buffering).
    resident = pl.BlockSpec(memory_space=pltpu.MemorySpace.VMEM)

    grid = (padded // lanes,)
    out_flat = pl.pallas_call(
        mlp_kernel,
        out_shape=jax.ShapeDtypeStruct((1, padded), jnp.float32),
        grid=grid,
        in_specs=[
            pl.BlockSpec((1, lanes), lambda i: (0, i)),   # x, lane-dense tile
            resident, resident,                           # w1, b1
            resident, resident,                           # w2, b2
            resident, resident,                           # w3, b3
            resident, resident,                           # w4, b4
        ],
        out_specs=pl.BlockSpec((1, lanes), lambda i: (0, i)),
        compiler_params=pltpu.CompilerParams(
            dimension_semantics=("parallel",)),
    )(x_flat, w1, b1, w2, b2, w3, b3, w4c, b4)

    return out_flat[0, :B].reshape(B, 1)


def init_params(key):
    """PyTorch nn.Linear default init: U(-1/sqrt(fan_in), 1/sqrt(fan_in)).
    Weights kept in torch's [out, in] ("feature-major") layout, biases as
    [out, 1] columns, so the kernel computes W @ h with batch along lanes."""
    dims = [(1, 64), (64, 32), (32, 16), (16, 1)]
    params = {}
    for idx, (fan_in, fan_out) in enumerate(dims, start=1):
        key, kw, kb = jax.random.split(key, 3)
        bound = 1.0 / (fan_in ** 0.5)
        params[f"w{idx}"] = jax.random.uniform(
            kw, (fan_out, fan_in), jnp.float32, -bound, bound)
        params[f"b{idx}"] = jax.random.uniform(
            kb, (fan_out, 1), jnp.float32, -bound, bound)
    return params


if __name__ == "__main__":
    key = jax.random.PRNGKey(0)
    key_p, key_x = jax.random.split(key)

    params = init_params(key_p)
    B = 300   # deliberately not a multiple of 128 to exercise the pad path
    x = jax.random.uniform(key_x, (B, 1), jnp.float32, 0.0, 10.0)

    # Small tile so the demo exercises multiple parallel grid steps.
    out = net_forward(x, params, tile_lanes=128)
    out = jax.block_until_ready(out)

    # Pure-JAX reference of the same forward pass (torch-layout params).
    def ref(x, p):
        h = jnp.maximum(x @ p["w1"].T + p["b1"].T, 0.0)
        h = jnp.maximum(h @ p["w2"].T + p["b2"].T, 0.0)
        h = jnp.maximum(h @ p["w3"].T + p["b3"].T, 0.0)
        y = h @ p["w4"].T + p["b4"].T
        return jnp.clip(y, 0.0, 180.0)

    expected = ref(x, params)
    assert out.shape == (B, 1)
    assert jnp.allclose(out, expected, atol=1e-4, rtol=1e-4)

    print("KERNEL_OK")
</pallas_src>

<mosaic_0001>
module attributes {stable_mosaic.version = 11 : i64} {
  func.func @mlp_kernel(%arg0: i32, %arg1: memref<1x128xf32, #tpu.memory_space<vmem>>, %arg2: memref<64x1xf32, #tpu.memory_space<vmem>>, %arg3: memref<64x1xf32, #tpu.memory_space<vmem>>, %arg4: memref<32x64xf32, #tpu.memory_space<vmem>>, %arg5: memref<32x1xf32, #tpu.memory_space<vmem>>, %arg6: memref<16x32xf32, #tpu.memory_space<vmem>>, %arg7: memref<16x1xf32, #tpu.memory_space<vmem>>, %arg8: memref<16x1xf32, #tpu.memory_space<vmem>>, %arg9: memref<1x1xf32, #tpu.memory_space<vmem>>, %arg10: memref<1x128xf32, #tpu.memory_space<vmem>>) attributes {dimension_semantics = [#tpu.dimension_semantics<parallel>], iteration_bounds = array<i64: 3>, scalar_prefetch = 0 : i64, scratch_operands = 0 : i64, tpu.core_type = #tpu.core_type<tc>, window_params = [{transform_indices = @transform_0, window_bounds = array<i64: 1, 128>}, {pipeline_mode = #tpu.pipeline_mode<synchronous>, transform_indices = @transform_1, window_bounds = array<i64: 64, 1>}, {pipeline_mode = #tpu.pipeline_mode<synchronous>, transform_indices = @transform_2, window_bounds = array<i64: 64, 1>}, {pipeline_mode = #tpu.pipeline_mode<synchronous>, transform_indices = @transform_3, window_bounds = array<i64: 32, 64>}, {pipeline_mode = #tpu.pipeline_mode<synchronous>, transform_indices = @transform_4, window_bounds = array<i64: 32, 1>}, {pipeline_mode = #tpu.pipeline_mode<synchronous>, transform_indices = @transform_5, window_bounds = array<i64: 16, 32>}, {pipeline_mode = #tpu.pipeline_mode<synchronous>, transform_indices = @transform_6, window_bounds = array<i64: 16, 1>}, {pipeline_mode = #tpu.pipeline_mode<synchronous>, transform_indices = @transform_7, window_bounds = array<i64: 16, 1>}, {pipeline_mode = #tpu.pipeline_mode<synchronous>, transform_indices = @transform_8, window_bounds = array<i64: 1, 1>}, {transform_indices = @transform_9, window_bounds = array<i64: 1, 128>}]} {
    %c0 = arith.constant 0 : index
    %c0_0 = arith.constant 0 : index
    %0 = vector.load %arg1[%c0, %c0_0] : memref<1x128xf32, #tpu.memory_space<vmem>>, vector<1x128xf32>
    %c0_1 = arith.constant 0 : index
    %c0_2 = arith.constant 0 : index
    %1 = vector.load %arg2[%c0_1, %c0_2] : memref<64x1xf32, #tpu.memory_space<vmem>>, vector<64x1xf32>
    %2 = vector.broadcast %1 : vector<64x1xf32> to vector<64x128xf32>
    %3 = vector.broadcast %0 : vector<1x128xf32> to vector<64x128xf32>
    %4 = arith.mulf %2, %3 : vector<64x128xf32>
    %c0_3 = arith.constant 0 : index
    %c0_4 = arith.constant 0 : index
    %5 = vector.load %arg3[%c0_3, %c0_4] : memref<64x1xf32, #tpu.memory_space<vmem>>, vector<64x1xf32>
    %6 = vector.broadcast %5 : vector<64x1xf32> to vector<64x128xf32>
    %7 = arith.addf %4, %6 : vector<64x128xf32>
    %cst = arith.constant 0.000000e+00 : f32
    %8 = vector.broadcast %cst : f32 to vector<64x128xf32>
    %9 = arith.maximumf %7, %8 : vector<64x128xf32>
    %c0_5 = arith.constant 0 : index
    %c0_6 = arith.constant 0 : index
    %10 = vector.load %arg4[%c0_5, %c0_6] : memref<32x64xf32, #tpu.memory_space<vmem>>, vector<32x64xf32>
    %cst_7 = arith.constant dense<0.000000e+00> : vector<32x128xf32>
    %11 = tpu.matmul %10, %9, %cst_7 {dimension_numbers = #tpu.dot_dimension_numbers<[1], [0], [0], [1], [0, 0, 1, 1], [], []>} : vector<32x64xf32>, vector<64x128xf32>, vector<32x128xf32> -> vector<32x128xf32>
    %c0_8 = arith.constant 0 : index
    %c0_9 = arith.constant 0 : index
    %12 = vector.load %arg5[%c0_8, %c0_9] : memref<32x1xf32, #tpu.memory_space<vmem>>, vector<32x1xf32>
    %13 = vector.broadcast %12 : vector<32x1xf32> to vector<32x128xf32>
    %14 = arith.addf %11, %13 : vector<32x128xf32>
    %cst_10 = arith.constant 0.000000e+00 : f32
    %15 = vector.broadcast %cst_10 : f32 to vector<32x128xf32>
    %16 = arith.maximumf %14, %15 : vector<32x128xf32>
    %c0_11 = arith.constant 0 : index
    %c0_12 = arith.constant 0 : index
    %17 = vector.load %arg6[%c0_11, %c0_12] : memref<16x32xf32, #tpu.memory_space<vmem>>, vector<16x32xf32>
    %cst_13 = arith.constant dense<0.000000e+00> : vector<16x128xf32>
    %18 = tpu.matmul %17, %16, %cst_13 {dimension_numbers = #tpu.dot_dimension_numbers<[1], [0], [0], [1], [0, 0, 1, 1], [], []>} : vector<16x32xf32>, vector<32x128xf32>, vector<16x128xf32> -> vector<16x128xf32>
    %c0_14 = arith.constant 0 : index
    %c0_15 = arith.constant 0 : index
    %19 = vector.load %arg7[%c0_14, %c0_15] : memref<16x1xf32, #tpu.memory_space<vmem>>, vector<16x1xf32>
    %20 = vector.broadcast %19 : vector<16x1xf32> to vector<16x128xf32>
    %21 = arith.addf %18, %20 : vector<16x128xf32>
    %cst_16 = arith.constant 0.000000e+00 : f32
    %22 = vector.broadcast %cst_16 : f32 to vector<16x128xf32>
    %23 = arith.maximumf %21, %22 : vector<16x128xf32>
    %c0_17 = arith.constant 0 : index
    %c0_18 = arith.constant 0 : index
    %24 = vector.load %arg8[%c0_17, %c0_18] : memref<16x1xf32, #tpu.memory_space<vmem>>, vector<16x1xf32>
    %25 = vector.broadcast %24 : vector<16x1xf32> to vector<16x128xf32>
    %26 = arith.mulf %25, %23 : vector<16x128xf32>
    %cst_19 = arith.constant dense<0.000000e+00> : vector<128xf32>
    %27 = vector.multi_reduction <add>, %26, %cst_19 [0] : vector<16x128xf32> to vector<128xf32>
    %28 = vector.shape_cast %27 : vector<128xf32> to vector<1x128xf32>
    %c0_20 = arith.constant 0 : index
    %c0_21 = arith.constant 0 : index
    %29 = vector.load %arg9[%c0_20, %c0_21] : memref<1x1xf32, #tpu.memory_space<vmem>>, vector<1x1xf32>
    %30 = vector.broadcast %29 : vector<1x1xf32> to vector<1x128xf32>
    %31 = arith.addf %28, %30 : vector<1x128xf32>
    %cst_22 = arith.constant 0.000000e+00 : f32
    %cst_23 = arith.constant 1.800000e+02 : f32
    %32 = vector.broadcast %cst_22 : f32 to vector<1x128xf32>
    %33 = arith.maximumf %32, %31 : vector<1x128xf32>
    %34 = vector.broadcast %cst_23 : f32 to vector<1x128xf32>
    %35 = arith.minimumf %34, %33 : vector<1x128xf32>
    %c0_24 = arith.constant 0 : index
    %c0_25 = arith.constant 0 : index
    %36 = vector.load %arg10[%c0_24, %c0_25] : memref<1x128xf32, #tpu.memory_space<vmem>>, vector<1x128xf32>
    tpu.vector_store %arg10[%c0_24, %c0_25], %35 {strides = array<i32>} : memref<1x128xf32, #tpu.memory_space<vmem>>, vector<1x128xf32>,
    return
  }
  func.func @transform_0(%arg0: i32) -> (i32, i32) {
    %c0_i32 = arith.constant 0 : i32
    %c0_i32_0 = arith.constant 0 : i32
    return %c0_i32, %arg0 : i32, i32
  }
  func.func @transform_1(%arg0: i32) -> (i32, i32) {
    %c0_i32 = arith.constant 0 : i32
    %c0_i32_0 = arith.constant 0 : i32
    %c0_i32_1 = arith.constant 0 : i32
    return %c0_i32, %c0_i32_0 : i32, i32
  }
  func.func @transform_2(%arg0: i32) -> (i32, i32) {
    %c0_i32 = arith.constant 0 : i32
    %c0_i32_0 = arith.constant 0 : i32
    %c0_i32_1 = arith.constant 0 : i32
    return %c0_i32, %c0_i32_0 : i32, i32
  }
  func.func @transform_3(%arg0: i32) -> (i32, i32) {
    %c0_i32 = arith.constant 0 : i32
    %c0_i32_0 = arith.constant 0 : i32
    %c0_i32_1 = arith.constant 0 : i32
    return %c0_i32, %c0_i32_0 : i32, i32
  }
  func.func @transform_4(%arg0: i32) -> (i32, i32) {
    %c0_i32 = arith.constant 0 : i32
    %c0_i32_0 = arith.constant 0 : i32
    %c0_i32_1 = arith.constant 0 : i32
    return %c0_i32, %c0_i32_0 : i32, i32
  }
  func.func @transform_5(%arg0: i32) -> (i32, i32) {
    %c0_i32 = arith.constant 0 : i32
    %c0_i32_0 = arith.constant 0 : i32
    %c0_i32_1 = arith.constant 0 : i32
    return %c0_i32, %c0_i32_0 : i32, i32
  }
  func.func @transform_6(%arg0: i32) -> (i32, i32) {
    %c0_i32 = arith.constant 0 : i32
    %c0_i32_0 = arith.constant 0 : i32
    %c0_i32_1 = arith.constant 0 : i32
    return %c0_i32, %c0_i32_0 : i32, i32
  }
  func.func @transform_7(%arg0: i32) -> (i32, i32) {
    %c0_i32 = arith.constant 0 : i32
    %c0_i32_0 = arith.constant 0 : i32
    %c0_i32_1 = arith.constant 0 : i32
    return %c0_i32, %c0_i32_0 : i32, i32
  }
  func.func @transform_8(%arg0: i32) -> (i32, i32) {
    %c0_i32 = arith.constant 0 : i32
    %c0_i32_0 = arith.constant 0 : i32
    %c0_i32_1 = arith.constant 0 : i32
    return %c0_i32, %c0_i32_0 : i32, i32
  }
  func.func @transform_9(%arg0: i32) -> (i32, i32) {
    %c0_i32 = arith.constant 0 : i32
    %c0_i32_0 = arith.constant 0 : i32
    return %c0_i32, %arg0 : i32, i32
  }
}

</mosaic_0001>

<bundles_post_ra>
// kernel: tpu_custom_call.1
= control target key start
LH: loop header
LB: loop body
LE: loop exit
PB: predicated region body
PF: predicated region fallthrough
CT: control target
= control target key end

     0   :  { %s1227_s0 = inlined_call_operand.vmem [shape: f32[1,384], index: 0, kind: input, shape index: {}]   ;;  %s1228_s1 = inlined_call_operand.vmem [shape: f32[64,1], index: 1, kind: input, shape index: {}]   ;;  %s1229_s2 = inlined_call_operand.vmem [shape: f32[64,1], index: 2, kind: input, shape index: {}]   ;;  %s1230_s3 = inlined_call_operand.vmem [shape: f32[32,64], index: 3, kind: input, shape index: {}]   ;;  %s1231_s4 = inlined_call_operand.vmem [shape: f32[32,1], index: 4, kind: input, shape index: {}]   ;;  %s1232_s5 = inlined_call_operand.vmem [shape: f32[16,32], index: 5, kind: input, shape index: {}]   ;;  %s1233_s6 = inlined_call_operand.vmem [shape: f32[16,1], index: 6, kind: input, shape index: {}]   ;;  %s1234_s7 = inlined_call_operand.vmem [shape: f32[16,1], index: 7, kind: input, shape index: {}]   ;;  %s1235_s8 = inlined_call_operand.<no memory space> [shape: f32[1,1], index: 8, kind: input, shape index: {}]   ;;  %s1236_s9 = inlined_call_operand.hbm [shape: f32[1,384], index: 9, kind: output, shape index: {}]  }
   0x1   :  { %v14_v0 = vstv %s1235_s8 }
   0x2   :  { %15 = vst [vmem:[#allocation2] sm:$0x1] %v14_v0 }
   0x3   :  { %16 = vsyncpa [#allocation4], 0 }
   0x4   :  { %18 = vsyncpa [#allocation4 + $0x1], 0  ;;  %s1031_s11 = smov 0   ;;  %s1033_s12 = smov 0  }
   0x5   :  { %s1035_s13 = smov 0   ;;  %s1037_s14 = smov 0  }
   0x6 LB: > { %s1052_s8 = sadd.s32 4294967295, %s974_s14   ;;  %s781_s15 = sadd.s32 4294967294, %s974_s14   ;;  %s974_s14 = sphi %s1037_s14, %s1242_s14   ;;  %s970_s13 = sphi %s1035_s13, %s1241_s13   ;;  %s966_s12 = sphi %s1033_s12, %s1240_s12   ;;  %s962_s11 = sphi %s1031_s11, %s1239_s11  }
   0x7   : > { %s1056_s16 = sadd.s32 1, %s974_s14   ;;  %s225_s17 = sadd.s32 1, %s970_s13 }
   0x8   : > { %s222_s18 = ssub.s32 %s974_s14, %s1056_s16  ;;  %p235_p0 = scmp.ne.s32.totalorder %s970_s13, %s966_s12 }
   0x9   : > { %p223_p1 = scmp.eq.s32.totalorder %s222_s18, 0  ;;  %p236_p2 = scmp.eq.s32.totalorder %s1052_s8, 2 }
   0xa   : > { %p241_p3 = scmp.ne.s32.totalorder %s966_s12, %s962_s11  ;;  %p242_p4 = scmp.eq.s32.totalorder %s781_s15, 2 }
   0xb   : > { %s1067_s19 = scalar_select %p223_p1, %s970_s13, %s225_s17  }
   0xc   : > { %p1069_p5 = por %p236_p2, %p235_p0  ;;  %p1073_p6 = por %p242_p4, %p241_p3 }
   0xd   : > { %p784_p7 = scmp.ge.s32.totalorder %s974_s14, 1  ;;  %p290_p8 = scmp.lt.s32.totalorder %s974_s14, 4 }
   0xf   : > { %p291_p9 = pnand %p784_p7, %p290_p8 }
  0x10   : > { %v389_v1 = vld [vmem:[%s1229_s2] sm:$0xff] (!%p291_p9)  ;;  %v976_v3 = vmov (!%p291_p9), 0   ;;  %v390_v4 = vld [vmem:[%s1229_s2 + $0x8] sm:$0xff] (!%p291_p9)  ;;  %v330_v6 = vld [vmem:[%s1228_s1 + $0x18] sm:$0xff] (!%p291_p9)  ;;  %vm481_vm0 = vcmask (!%p291_p9), 523264   ;;  %p323_p10 = scmp.lt.s32.totalorder (!%p291_p9), %s1052_s8, 2 }
  0x11   : > { %294 = sbr.rel (%p291_p9) target bundleno = 664 (0x298), region = 56  ;;  %v327_v2 = vld [vmem:[%s1228_s1] sm:$0xff] (!%p291_p9)  ;;  %911 = vset.pattern.permute.xlu1 (!%p291_p9), %v976_v3  ;;  %910 = vset.pattern.permute.xlu0 (!%p291_p9), %v976_v3  ;;  %v328_v5 = vld [vmem:[%s1228_s1 + $0x8] sm:$0xff] (!%p291_p9)  ;;  %v329_v7 = vld [vmem:[%s1228_s1 + $0x10] sm:$0xff] (!%p291_p9)  ;;  %vm597_vm1 = vcmask (!%p291_p9), 261120   ;;  %s321_s18 = sand.u32 (!%p291_p9), 1, %s966_s12  }
  0x12   : > { %399 = vperm.xlu1 (!%p291_p9), %911, %v389_v1   ;;  %337 = vperm.xlu0 (!%p291_p9), %910, %v327_v2   ;;  %v392_v8 = vld [vmem:[%s1229_s2 + $0x18] sm:$0xff] (!%p291_p9)  ;;  %v391_v9 = vld [vmem:[%s1229_s2 + $0x10] sm:$0xff] (!%p291_p9)  ;;  %v332_v10 = vld [vmem:[%s1228_s1 + $0x28] sm:$0xff] (!%p291_p9)  ;;  %s792_s22 = sshll.u32 (!%p291_p9), %s1052_s8, 4  ;;  %s717_s28 = scalar_lea.sflag (!%p291_p9), [#allocation4], %s321_s18 }
  0x13   : > { %v331_v11 = vld [vmem:[%s1228_s1 + $0x20] sm:$0xff] (!%p291_p9)  ;;  %v394_v12 = vld [vmem:[%s1229_s2 + $0x28] sm:$0xff] (!%p291_p9)  ;;  %v334_v14 = vld [vmem:[%s1228_s1 + $0x38] sm:$0xff] (!%p291_p9)  ;;  %s1185_s27 = scalar_lea.hbm (!%p291_p9), %s1236_s9, %s792_s22 }
  0x14   : > { %v393_v13 = vld [vmem:[%s1229_s2 + $0x20] sm:$0xff] (!%p291_p9)  ;;  %v333_v15 = vld [vmem:[%s1228_s1 + $0x30] sm:$0xff] (!%p291_p9)  ;;  %v396_v16 = vld [vmem:[%s1229_s2 + $0x38] sm:$0xff] (!%p291_p9) }
  0x15   : > { %v395_v17 = vld [vmem:[%s1229_s2 + $0x30] sm:$0xff] (!%p291_p9)  ;;  %v458_v18 = vld [vmem:[%s1231_s4 + $0x8] sm:$0xff] (!%p291_p9)  ;;  %v457_v19 = vld [vmem:[%s1231_s4] sm:$0xff] (!%p291_p9) }
  0x16   : > { %404 = vperm.xlu1 (!%p291_p9), %911, %v390_v4   ;;  %342 = vperm.xlu0 (!%p291_p9), %910, %v328_v5   ;;  %v460_v20 = vld [vmem:[%s1231_s4 + $0x18] sm:$0xff] (!%p291_p9)  ;;  %v459_v21 = vld [vmem:[%s1231_s4 + $0x10] sm:$0xff] (!%p291_p9)  ;;  %v453_v22 = vld [vmem:[%s1230_s3] sm:$0xff] (!%p291_p9) }
  0x17   : > { %v586_v23 = vld [vmem:[%s1233_s6 + $0x8] sm:$0xff] (!%p291_p9)  ;;  %v585_v24 = vld [vmem:[%s1233_s6] sm:$0xff] (!%p291_p9)  ;;  %829 = vmatprep.mubr.msk.f32.mxu0 (!%p291_p9), %vm481_vm0, %v453_v22 }
  0x18   : > { %v682_v25 = vld [vmem:[%s1234_s7 + $0x8] sm:$0xff]  ;;  %v681_v26 = vld [vmem:[%s1234_s7] sm:$0xff]  ;;  %s324_s17 = scalar_select %p323_p10, %s1052_s8, 2 }
  0x19   : > { %v702_v27 = vld [vmem:[#allocation2] sm:$0x1]  ;;  %s977_s8 = smov [#allocation3]  }
  0x1a   : > { %352 = vperm.xlu1 %911, %v330_v6   ;;  %347 = vperm.xlu0 %910, %v329_v7   ;;  %s325_s23 = scalar_lea.vmem %s1227_s0, %s324_s17  ;;  %s916_s30 = sshll.u32 %s977_s8, 4  ;;  %s917_s30 = int_to_ptr.vmem [resolvable:$false] %s916_s30 }
  0x1b   : > { %v785_v28 = vld [vmem:[%s325_s23] ss:$0 sm:$0xff]  ;;  %s322_s23 = scalar_lea.vmem [#allocation3], %s321_s18  ;;  %s918_s10 = scalar_lea.vmem %s917_s30, 32 }
  0x1c   : > { %s729_s24 = sshll.u32 %s322_s23, 4  ;;  %s1187_s24 = int_to_ptr.vmem [resolvable:$true] %s729_s24 }
  0x1d   : > { %s912_s29 = scalar_lea.vmem %s1187_s24, 16  ;;  %p919_p0 = scmp.lt.s32.totalorder %s1187_s24, %s917_s30 }
  0x1e   : > { %414 = vperm.xlu1 %911, %v392_v8   ;;  %409 = vperm.xlu0 %910, %v391_v9   ;;  %v454_v9 = vld [vmem:[%s1230_s3 + $0x8] sm:$0xff]  ;;  %p913_p11 = scmp.ne.s32.totalorder %s1187_s24, %s912_s29  ;;  %p920_p1 = scmp.lt.s32.totalorder %s918_s10, %s912_s29 }
  0x20   : > { %p914_p12 = pnand %p913_p11, %p1069_p5  ;;  %p921_p2 = por %p920_p1, %p919_p0 }
  0x22   : > { %362 = vperm.xlu1 %911, %v332_v10   ;;  %357 = vperm.xlu0 %910, %v331_v11   ;;  %v455_v10 = vld [vmem:[%s1230_s3 + $0x10] sm:$0xff]  ;;  %v456_v11 = vld [vmem:[%s1230_s3 + $0x18] sm:$0xff]  ;;  %p915_p13 = pneg %p914_p12 }
  0x24   : > { %p922_p3 = pnand %p921_p2, %p915_p13 }
  0x26   : > { %424 = vperm.xlu1 %911, %v394_v12   ;;  %419 = vperm.xlu0 %910, %v393_v13   ;;  %v583_v12 = vld [vmem:[%s1232_s5] sm:$0xff] }
  0x27   : > { %843 = vmatprep.mubr.msk.f32.mxu1 %vm597_vm1, %v583_v12 }
  0x2a   : > { %372 = vperm.xlu1 %911, %v334_v14   ;;  %367 = vperm.xlu0 %910, %v333_v15  }
  0x2e   : > { %434 = vperm.xlu1 %911, %v396_v16   ;;  %429 = vperm.xlu0 %910, %v395_v17  }
  0x32   : > { %468 = vperm.xlu1 %911, %v458_v18   ;;  %463 = vperm.xlu0 %910, %v457_v19  }
  0x36   : > { %478 = vperm.xlu1 %911, %v460_v20   ;;  %473 = vperm.xlu0 %910, %v459_v21  }
  0x3a   : > { %594 = vperm.xlu1 %911, %v586_v23   ;;  %589 = vperm.xlu0 %910, %v585_v24  }
  0x3e   : > { %690 = vperm.xlu1 %911, %v682_v25   ;;  %685 = vperm.xlu0 %910, %v681_v26  }
  0x42   : > { %705 = vperm.xlu0 %910, %v702_v27  }
  0x91   : > { %v400_v29 = vpop.permute.xlu1 %399  ;;  %v338_v30 = vpop.permute.xlu0 %337 }
  0x92   : > { %v381_v31 = vmul.f32 %v785_v28, %v338_v30 }
  0x94   : > { %v437_v34 = vadd.f32 %v400_v29, %v381_v31  ;;  %v584_v31 = vld [vmem:[%s1232_s5 + $0x8] sm:$0xff] }
  0x95   : > { %v405_v32 = vpop.permute.xlu1 %404  ;;  %v343_v33 = vpop.permute.xlu0 %342 }
  0x96   : > { %v382_v35 = vmul.f32 %v785_v28, %v343_v33  ;;  %v445_v39 = vmax.f32 %v437_v34, 0.0 }
  0x98   : > { %v438_v36 = vadd.f32 %v405_v32, %v382_v35 }
  0x99   : > { %v353_v37 = vpop.permute.xlu1 %352  ;;  %v348_v38 = vpop.permute.xlu0 %347 }
  0x9a   : > { %v446_v40 = vmax.f32 %v438_v36, 0.0  ;;  %v384_v41 = vmul.f32 %v785_v28, %v353_v37  ;;  %v383_v42 = vmul.f32 %v785_v28, %v348_v38 }
  0x9c   : > { %v846_v43 = vpack.c.bf16 %v446_v40, %v445_v39 }
  0x9d   : > { %v415_v44 = vpop.permute.xlu1 %414  ;;  %v410_v45 = vpop.permute.xlu0 %409 }
  0x9e   : > { %v440_v46 = vadd.f32 %v415_v44, %v384_v41  ;;  %v439_v47 = vadd.f32 %v410_v45, %v383_v42  ;;  %847 = vmatprep.subr.bf16.mxu0 %v846_v43  ;;  %v708_v44 = vlaneseq }
  0x9f   : > { %849 = vmatpush3.bf16.msra.mxu0 %v846_v43 }
  0xa0   : > { %v448_v48 = vmax.f32 %v440_v46, 0.0  ;;  %v447_v49 = vmax.f32 %v439_v47, 0.0  ;;  %v709_v47 = vshrl.u32 %v708_v44, 7 }
  0xa1   : > { %v363_v50 = vpop.permute.xlu1 %362  ;;  %v358_v51 = vpop.permute.xlu0 %357 }
  0xa2   : > { %v850_v52 = vpack.c.bf16 %v448_v48, %v447_v49  ;;  %v386_v53 = vmul.f32 %v785_v28, %v363_v50  ;;  %v385_v54 = vmul.f32 %v785_v28, %v358_v51  ;;  %v710_v50 = vsub.s32 0, %v709_v47 }
  0xa4   : > { %851 = vmatprep.subr.bf16.mxu0 %v850_v52 }
  0xa5   : > { %v425_v55 = vpop.permute.xlu1 %424  ;;  %v420_v56 = vpop.permute.xlu0 %419  ;;  %853 = vmatpush3.bf16.msra.mxu0 %v850_v52 }
  0xa6   : > { %v442_v57 = vadd.f32 %v425_v55, %v386_v53  ;;  %v441_v58 = vadd.f32 %v420_v56, %v385_v54 }
  0xa8   : > { %v450_v59 = vmax.f32 %v442_v57, 0.0  ;;  %v449_v60 = vmax.f32 %v441_v58, 0.0 }
  0xa9   : > { %v373_v61 = vpop.permute.xlu1 %372  ;;  %v368_v62 = vpop.permute.xlu0 %367 }
  0xaa   : > { %v854_v63 = vpack.c.bf16 %v450_v59, %v449_v60  ;;  %v388_v0 = vmul.f32 %v785_v28, %v373_v61  ;;  %v387_v1 = vmul.f32 %v785_v28, %v368_v62 }
  0xac   : > { %855 = vmatprep.subr.bf16.mxu0 %v854_v63 }
  0xad   : > { %v435_v2 = vpop.permute.xlu1 %434  ;;  %v430_v3 = vpop.permute.xlu0 %429  ;;  %857 = vmatpush3.bf16.msra.mxu0 %v854_v63 }
  0xae   : > { %v444_v4 = vadd.f32 %v435_v2, %v388_v0  ;;  %v443_v5 = vadd.f32 %v430_v3, %v387_v1 }
  0xb0   : > { %v452_v6 = vmax.f32 %v444_v4, 0.0  ;;  %v451_v7 = vmax.f32 %v443_v5, 0.0 }
  0xb1   : > { %v469_v13 = vpop.permute.xlu1 %468  ;;  %v464_v14 = vpop.permute.xlu0 %463 }
  0xb2   : > { %v858_v8 = vpack.c.bf16 %v452_v6, %v451_v7 }
  0xb4   : > { %859 = vmatprep.subr.bf16.mxu0 %v858_v8 }
  0xb5   : > { %861 = vmatpush3.bf16.msra.mxu0 %v858_v8  ;;  %v479_v20 = vpop.permute.xlu1 %478  ;;  %v474_v23 = vpop.permute.xlu0 %473 }
  0xb8   : > { %830 = vmatmul.mubr.msk.f32.vlgmr.msra.gmra.mrb[0].mxu0 %vm481_vm0, %v454_v9 }
  0xb9   : > { %832 = vmatprep.mubr.msk.f32.mxu0 %vm481_vm0, %v455_v10  ;;  %v595_v32 = vpop.permute.xlu1 %594  ;;  %v590_v33 = vpop.permute.xlu0 %589 }
  0xbc   : > { %833 = vmatmul.mubr.msk.f32.gmra.mrb[2].mxu0 %vm481_vm0, %v456_v11 }
  0xbd   : > { %v691_v39 = vpop.permute.xlu1 %690  ;;  %v686_v41 = vpop.permute.xlu0 %685 }
  0xc1   : > { %v706_v52 = vpop.permute.xlu0 %705 }
  0xc2   : > { %v711_v54 = vrot.slane %v706_v52, %v710_v50 }
 0x18b   : > { %v831_v15 = vpop.f32.mrb[0].mxu0 }
 0x18c   : > { %v566_v16 = vadd.f32 %v831_v15, %v469_v13  ;;  %v560_v17 = vpop.f32.mrb[1].mxu0 }
 0x18d   : > { %v561_v18 = vadd.f32 %v560_v17, %v464_v14 }
 0x18e   : > { %v580_v19 = vmax.f32 %v566_v16, 0.0 }
 0x18f   : > { %v579_v21 = vmax.f32 %v561_v18, 0.0  ;;  %v834_v22 = vpop.f32.mrb[2].mxu0 }
 0x190   : > { %v576_v24 = vadd.f32 %v834_v22, %v479_v20  ;;  %v570_v25 = vpop.f32.mrb[3].mxu0 }
 0x191   : > { %v571_v26 = vadd.f32 %v570_v25, %v474_v23  ;;  %v862_v27 = vpack.c.bf16 %v580_v19, %v579_v21 }
 0x192   : > { %v582_v28 = vmax.f32 %v576_v24, 0.0 }
 0x193   : > { %v581_v29 = vmax.f32 %v571_v26, 0.0  ;;  %863 = vmatprep.subr.bf16.mxu1 %v862_v27 }
 0x194   : > { %865 = vmatpush3.bf16.msra.mxu1 %v862_v27 }
 0x195   : > { %v866_v30 = vpack.c.bf16 %v582_v28, %v581_v29 }
 0x197   : > { %867 = vmatprep.subr.bf16.mxu1 %v866_v30 }
 0x198   : > { %869 = vmatpush3.bf16.msra.mxu1 %v866_v30 }
 0x19b   : > { %844 = vmatmul.mubr.msk.f32.vlgmr.msra.gmra.mrb[0].mxu1 %vm597_vm1, %v584_v31 }
 0x26e   : > { %v845_v34 = vpop.f32.mrb[0].mxu1 }
 0x26f   : > { %v676_v35 = vadd.f32 %v845_v34, %v595_v32  ;;  %v670_v36 = vpop.f32.mrb[1].mxu1 }
 0x270   : > { %v671_v37 = vadd.f32 %v670_v36, %v590_v33 }
 0x271   : > { %v680_v38 = vmax.f32 %v676_v35, 0.0 }
 0x272   : > { %v679_v40 = vmax.f32 %v671_v37, 0.0 }
 0x273   : > { %v694_v42 = vmul.f32 %v691_v39, %v680_v38 }
 0x274   : > { %v693_v43 = vmul.f32 %v686_v41, %v679_v40 }
 0x276   : > { %v695_v45 = vadd.f32 %v694_v42, %v693_v43 }
 0x278   : > { %v696_v46 = vrot.slane %v695_v45, 4 }
 0x27a   : > { %v697_v48 = vadd.f32 %v696_v46, %v695_v45 }
 0x27c   : > { %v698_v49 = vrot.slane %v697_v48, 2 }
 0x27e   : > { %v699_v51 = vadd.f32 %v698_v49, %v697_v48 }
 0x280   : > { %v700_v53 = vrot.slane %v699_v51, 1 }
 0x282   : > { %v701_v55 = vadd.f32 %v700_v53, %v699_v51 }
 0x284   : > { %v712_v56 = vadd.f32 %v711_v54, %v701_v55 }
 0x286   : > { %v713_v57 = vmax.f32 %v712_v56, 0.0 }
 0x288   : > { %v714_v58 = vmin.f32 %v713_v57, 180.0 }
 0x28a   : > { %715 = vst [vmem:[%s322_s23] sm:$0x1] %v714_v58 }
 0x28b   : > { %925 = shalt.err (!%p922_p3)
}
 0x28c   : > { %s926_s15 = scalar_lea.hbm %s1185_s27, 16  ;;  %s930_s22 = scalar_lea.hbm %s1236_s9, 48 }
 0x28d   : > { %p927_p4 = scmp.ne.s32.totalorder %s1185_s27, %s926_s15  ;;  %p931_p9 = scmp.lt.u32.totalorder %s1185_s27, %s1236_s9 }
 0x28e   : > { %p932_p10 = scmp.lt.u32.totalorder %s930_s22, %s926_s15  ;;  %p934_p12 = scmp.lt.u32.totalorder %s926_s15, %s1185_s27 }
 0x28f   : > { %p928_p7 = pnand %p927_p4, %p1069_p5 }
 0x290   : > { %p933_p11 = por %p932_p10, %p931_p9 }
 0x291   : > { %p929_p8 = pneg %p928_p7 }
 0x292   : > { %p935_p13 = por %p934_p12, %p933_p11 }
 0x294   : > { %p936_p0 = pnand %p935_p13, %p929_p8 }
 0x296   : > { %939 = shalt.err (!%p936_p0)
}
 0x297   : > { %870 = dma.vmem_to_hbm [thread:$0]  (%p1069_p5), %s1187_s24, 16, %s1185_s27, %s717_s28  }
 0x298 PF: > { %p876_p1 = scmp.ge.s32.totalorder %s974_s14, 2  ;;  %s741_s26 = sand.u32 1, %s962_s11  }
 0x299   : > { %s742_s29 = scalar_lea.sflag [#allocation4], %s741_s26 }
 0x29a   : > { %p873_p2 = pnand %p876_p1, %p1073_p6 }
 0x29c   : > { %957 = dma.done.wait (!%p873_p2), %s742_s29, 16  }
 0x29d   : > { %959 = vsyncadd (!%p873_p2), %s742_s29, 4294967280  ;;  %p21_p3 = scmp.ge.s32.totalorder %s1056_s16, 5   ;;  %s1239_s11 = smov %s966_s12 }
 0x29e   : > { %s1240_s12 = smov %s970_s13  ;;  %s1241_s13 = smov %s1067_s19 }
 0x29f   : > { %s1242_s14 = smov %s1056_s16  ;;  %23 = sbr.rel (!%p21_p3) target bundleno = 6 (0x6), region = 91 }
 0x2a6   :  { %746 = vsyncpa [#allocation4], 1 }
 0x2a7   :  { %748 = vsyncpa [#allocation4 + $0x1], 1 }

</bundles_post_ra>
